<compile_context>
chip_gen: v5e
topology: v5e:2x2
jax: 0.10.0
libtpu: 0.0.40
codegen_flags: <defaults>
</compile_context>

<pallas_src>
import jax
import jax.numpy as jnp
from jax.experimental import pallas as pl
from jax.experimental.pallas import tpu as pltpu

EPS = 1e-5  # nn.LayerNorm default


def _round_up(x, m):
    return ((x + m - 1) // m) * m


def _prenorm_linear_kernel(x_ref, gamma_ref, beta_ref, w_ref, bias_ref, o_ref, y_ref):
    # Grid: (row_tiles, col_tiles).  The x row-tile and gamma/beta are resident
    # across the j (column) axis; LayerNorm is computed once per row tile into
    # the f32 VMEM scratch y_ref, then each j step is a single MXU matmul
    # against one (D, TILE_N) slab of W.
    @pl.when(pl.program_id(1) == 0)
    def _():
        x = x_ref[...].astype(jnp.float32)
        mean = jnp.mean(x, axis=-1, keepdims=True)
        centered = x - mean
        var = jnp.mean(centered * centered, axis=-1, keepdims=True)
        inv_std = jax.lax.rsqrt(var + EPS)
        gamma = gamma_ref[...].astype(jnp.float32)
        beta = beta_ref[...].astype(jnp.float32)
        y_ref[...] = (centered * inv_std) * gamma + beta

    # fn = Linear(dim, dim): y @ W[:, j-slab] + b[j-slab].
    # Cast to the weight dtype (bf16 fast path on v6e/v7x); f32 accumulate.
    y = y_ref[...].astype(w_ref.dtype)
    out = jnp.dot(y, w_ref[...], preferred_element_type=jnp.float32)
    out = out + bias_ref[...].astype(jnp.float32)
    o_ref[...] = out.astype(o_ref.dtype)


def prenorm_linear(x, gamma, beta, w, b, *, tile_rows=256, tile_cols=512):
    """x: [B, S, D] -> PreNorm(LayerNorm(D), Linear(D, D))(x) : [B, S, D]."""
    B, S, D = x.shape
    rows = B * S

    # Row tile: large and MXU-aligned (multiple of 8 sublanes, 256 default),
    # clamped down for tiny inputs; rows padded up to a whole number of tiles.
    tm = max(8, _round_up(tile_rows, 8))
    tm = min(tm, _round_up(rows, 8))
    rows_p = _round_up(rows, tm)

    # Column tile over W / output: lane-dense (multiple of 128) or full D.
    tn = min(tile_cols, D)
    if D % tn != 0 or tn % 128 != 0:
        tn = D

    x2 = x.reshape(rows, D)
    if rows_p != rows:
        # Zero-padded tail rows produce finite garbage (beta @ W + b) that is
        # sliced off below; no NaNs since var+eps > 0.
        x2 = jnp.pad(x2, ((0, rows_p - rows), (0, 0)))
    gamma2 = gamma.reshape(1, D)
    beta2 = beta.reshape(1, D)
    bias2 = b.reshape(1, D)

    grid = (rows_p // tm, D // tn)

    # Explicit VMEM budget: double-buffered x/out tiles + W slab + y scratch.
    in_itemsize = jnp.dtype(x.dtype).itemsize
    w_itemsize = jnp.dtype(w.dtype).itemsize
    vmem_bytes = (
        2 * tm * D * in_itemsize      # x tile (double-buffered)
        + 2 * tm * tn * in_itemsize   # out tile (double-buffered)
        + 2 * D * tn * w_itemsize     # W column slab
        + tm * D * 4                  # y scratch (f32)
        + 4 * D * 4                   # gamma / beta / bias
    )
    vmem_limit = int(min(max(2 * vmem_bytes, 32 * 1024 * 1024), 64 * 1024 * 1024))

    out2 = pl.pallas_call(
        _prenorm_linear_kernel,
        out_shape=jax.ShapeDtypeStruct((rows_p, D), x.dtype),
        grid_spec=pltpu.PrefetchScalarGridSpec(
            num_scalar_prefetch=0,
            grid=grid,
            in_specs=[
                pl.BlockSpec((tm, D), lambda i, j: (i, 0)),   # x row tile (resident over j)
                pl.BlockSpec((1, D), lambda i, j: (0, 0)),    # gamma
                pl.BlockSpec((1, D), lambda i, j: (0, 0)),    # beta
                pl.BlockSpec((D, tn), lambda i, j: (0, j)),   # W column slab
                pl.BlockSpec((1, tn), lambda i, j: (0, j)),   # bias slab
            ],
            out_specs=pl.BlockSpec((tm, tn), lambda i, j: (i, j)),
            scratch_shapes=[pltpu.VMEM((tm, D), jnp.float32)],
        ),
        compiler_params=pltpu.CompilerParams(
            dimension_semantics=("parallel", "arbitrary"),
            vmem_limit_bytes=vmem_limit,
        ),
    )(x2, gamma2, beta2, w, bias2)

    if rows_p != rows:
        out2 = out2[:rows]
    return out2.reshape(B, S, D)


def prenorm_linear_ref(x, gamma, beta, w, b):
    mean = jnp.mean(x, axis=-1, keepdims=True)
    var = jnp.mean((x - mean) ** 2, axis=-1, keepdims=True)
    y = (x - mean) / jnp.sqrt(var + EPS) * gamma + beta
    return jnp.einsum("bsd,de->bse", y, w) + b


if __name__ == "__main__":
    key = jax.random.PRNGKey(0)
    # Lane-dense hidden dim (multiple of 128) as a TPU-realistic small config.
    B, S, D = 2, 8, 128

    k_x, k_w, k_b = jax.random.split(key, 3)
    x = jax.random.normal(k_x, (B, S, D), dtype=jnp.float32)

    # LayerNorm params: PyTorch default init (ones / zeros)
    gamma = jnp.ones((D,), dtype=jnp.float32)
    beta = jnp.zeros((D,), dtype=jnp.float32)

    # fn = Linear(D, D) params, deterministic synthetic init
    w = jax.random.normal(k_w, (D, D), dtype=jnp.float32) * 0.05
    b = jax.random.normal(k_b, (D,), dtype=jnp.float32) * 0.01

    out = prenorm_linear(x, gamma, beta, w, b)
    out = jax.block_until_ready(out)

    ref = prenorm_linear_ref(x, gamma, beta, w, b)
    assert out.shape == (B, S, D)
    assert jnp.allclose(out, ref, atol=2e-3, rtol=2e-3), "mismatch vs reference"

    print("KERNEL_OK")
</pallas_src>

<mosaic_0001>
module attributes {stable_mosaic.version = 11 : i64} {
  func.func @_prenorm_linear_kernel(%arg0: i32, %arg1: i32, %arg2: memref<16x128xf32, #tpu.memory_space<vmem>>, %arg3: memref<1x128xf32, #tpu.memory_space<vmem>>, %arg4: memref<1x128xf32, #tpu.memory_space<vmem>>, %arg5: memref<128x128xf32, #tpu.memory_space<vmem>>, %arg6: memref<1x128xf32, #tpu.memory_space<vmem>>, %arg7: memref<16x128xf32, #tpu.memory_space<vmem>>, %arg8: memref<16x128xf32, #tpu.memory_space<vmem>>) attributes {dimension_semantics = [#tpu.dimension_semantics<parallel>, #tpu.dimension_semantics<arbitrary>], iteration_bounds = array<i64: 1, 1>, scalar_prefetch = 0 : i64, scratch_operands = 1 : i64, tpu.core_type = #tpu.core_type<tc>, window_params = [{transform_indices = @transform_0, window_bounds = array<i64: 16, 128>}, {pipeline_mode = #tpu.pipeline_mode<synchronous>, transform_indices = @transform_1, window_bounds = array<i64: 1, 128>}, {pipeline_mode = #tpu.pipeline_mode<synchronous>, transform_indices = @transform_2, window_bounds = array<i64: 1, 128>}, {transform_indices = @transform_3, window_bounds = array<i64: 128, 128>}, {transform_indices = @transform_4, window_bounds = array<i64: 1, 128>}, {transform_indices = @transform_5, window_bounds = array<i64: 16, 128>}]} {
    %c0_i32 = arith.constant 0 : i32
    %0 = arith.cmpi eq, %arg1, %c0_i32 : i32
    %1 = arith.extui %0 : i1 to i32
    %c0_i32_0 = arith.constant 0 : i32
    %2 = arith.cmpi ne, %1, %c0_i32_0 : i32
    scf.if %2 {
      %c0_8 = arith.constant 0 : index
      %c0_9 = arith.constant 0 : index
      %10 = vector.load %arg2[%c0_8, %c0_9] : memref<16x128xf32, #tpu.memory_space<vmem>>, vector<16x128xf32>
      %cst_10 = arith.constant dense<0.000000e+00> : vector<16xf32>
      %11 = vector.multi_reduction <add>, %10, %cst_10 [1] : vector<16x128xf32> to vector<16xf32>
      %12 = vector.shape_cast %11 : vector<16xf32> to vector<16x1xf32>
      %cst_11 = arith.constant 1.280000e+02 : f32
      %13 = vector.broadcast %cst_11 : f32 to vector<16x1xf32>
      %14 = arith.divf %12, %13 : vector<16x1xf32>
      %15 = vector.broadcast %14 : vector<16x1xf32> to vector<16x128xf32>
      %16 = arith.subf %10, %15 : vector<16x128xf32>
      %17 = arith.mulf %16, %16 : vector<16x128xf32>
      %cst_12 = arith.constant dense<0.000000e+00> : vector<16xf32>
      %18 = vector.multi_reduction <add>, %17, %cst_12 [1] : vector<16x128xf32> to vector<16xf32>
      %19 = vector.shape_cast %18 : vector<16xf32> to vector<16x1xf32>
      %cst_13 = arith.constant 1.280000e+02 : f32
      %20 = vector.broadcast %cst_13 : f32 to vector<16x1xf32>
      %21 = arith.divf %19, %20 : vector<16x1xf32>
      %cst_14 = arith.constant 9.99999974E-6 : f32
      %22 = vector.broadcast %cst_14 : f32 to vector<16x1xf32>
      %23 = arith.addf %21, %22 : vector<16x1xf32>
      %24 = math.rsqrt %23 : vector<16x1xf32>
      %c0_15 = arith.constant 0 : index
      %c0_16 = arith.constant 0 : index
      %25 = vector.load %arg3[%c0_15, %c0_16] : memref<1x128xf32, #tpu.memory_space<vmem>>, vector<1x128xf32>
      %c0_17 = arith.constant 0 : index
      %c0_18 = arith.constant 0 : index
      %26 = vector.load %arg4[%c0_17, %c0_18] : memref<1x128xf32, #tpu.memory_space<vmem>>, vector<1x128xf32>
      %27 = vector.broadcast %24 : vector<16x1xf32> to vector<16x128xf32>
      %28 = arith.mulf %16, %27 : vector<16x128xf32>
      %29 = vector.broadcast %25 : vector<1x128xf32> to vector<16x128xf32>
      %30 = arith.mulf %28, %29 : vector<16x128xf32>
      %31 = vector.broadcast %26 : vector<1x128xf32> to vector<16x128xf32>
      %32 = arith.addf %30, %31 : vector<16x128xf32>
      %c0_19 = arith.constant 0 : index
      %c0_20 = arith.constant 0 : index
      %33 = vector.load %arg8[%c0_19, %c0_20] : memref<16x128xf32, #tpu.memory_space<vmem>>, vector<16x128xf32>
      tpu.vector_store %arg8[%c0_19, %c0_20], %32 {strides = array<i32>} : memref<16x128xf32, #tpu.memory_space<vmem>>, vector<16x128xf32>,
    } else {
    }
    %c0 = arith.constant 0 : index
    %c0_1 = arith.constant 0 : index
    %3 = vector.load %arg8[%c0, %c0_1] : memref<16x128xf32, #tpu.memory_space<vmem>>, vector<16x128xf32>
    %c0_2 = arith.constant 0 : index
    %c0_3 = arith.constant 0 : index
    %4 = vector.load %arg5[%c0_2, %c0_3] : memref<128x128xf32, #tpu.memory_space<vmem>>, vector<128x128xf32>
    %cst = arith.constant dense<0.000000e+00> : vector<16x128xf32>
    %5 = tpu.matmul %3, %4, %cst {dimension_numbers = #tpu.dot_dimension_numbers<[1], [0], [0], [1], [0, 0, 1, 1], [], []>} : vector<16x128xf32>, vector<128x128xf32>, vector<16x128xf32> -> vector<16x128xf32>
    %c0_4 = arith.constant 0 : index
    %c0_5 = arith.constant 0 : index
    %6 = vector.load %arg6[%c0_4, %c0_5] : memref<1x128xf32, #tpu.memory_space<vmem>>, vector<1x128xf32>
    %7 = vector.broadcast %6 : vector<1x128xf32> to vector<16x128xf32>
    %8 = arith.addf %5, %7 : vector<16x128xf32>
    %c0_6 = arith.constant 0 : index
    %c0_7 = arith.constant 0 : index
    %9 = vector.load %arg7[%c0_6, %c0_7] : memref<16x128xf32, #tpu.memory_space<vmem>>, vector<16x128xf32>
    tpu.vector_store %arg7[%c0_6, %c0_7], %8 {strides = array<i32>} : memref<16x128xf32, #tpu.memory_space<vmem>>, vector<16x128xf32>,
    return
  }
  func.func @transform_0(%arg0: i32, %arg1: i32) -> (i32, i32) {
    %c0_i32 = arith.constant 0 : i32
    %c0_i32_0 = arith.constant 0 : i32
    return %arg0, %c0_i32 : i32, i32
  }
  func.func @transform_1(%arg0: i32, %arg1: i32) -> (i32, i32) {
    %c0_i32 = arith.constant 0 : i32
    %c0_i32_0 = arith.constant 0 : i32
    %c0_i32_1 = arith.constant 0 : i32
    return %c0_i32, %c0_i32_0 : i32, i32
  }
  func.func @transform_2(%arg0: i32, %arg1: i32) -> (i32, i32) {
    %c0_i32 = arith.constant 0 : i32
    %c0_i32_0 = arith.constant 0 : i32
    %c0_i32_1 = arith.constant 0 : i32
    return %c0_i32, %c0_i32_0 : i32, i32
  }
  func.func @transform_3(%arg0: i32, %arg1: i32) -> (i32, i32) {
    %c0_i32 = arith.constant 0 : i32
    %c0_i32_0 = arith.constant 0 : i32
    return %c0_i32, %arg1 : i32, i32
  }
  func.func @transform_4(%arg0: i32, %arg1: i32) -> (i32, i32) {
    %c0_i32 = arith.constant 0 : i32
    %c0_i32_0 = arith.constant 0 : i32
    return %c0_i32, %arg1 : i32, i32
  }
  func.func @transform_5(%arg0: i32, %arg1: i32) -> (i32, i32) {
    %c0_i32 = arith.constant 0 : i32
    return %arg0, %arg1 : i32, i32
  }
}

</mosaic_0001>

<bundles_post_ra>
// kernel: tpu_custom_call.1
= control target key start
LH: loop header
LB: loop body
LE: loop exit
PB: predicated region body
PF: predicated region fallthrough
CT: control target
= control target key end

     0   :  { %10 = vsyncpa [#allocation4], 0  ;;  %s408_s0 = inlined_call_operand.hbm [shape: f32[16,128], index: 0, kind: input, shape index: {}]   ;;  %s409_s1 = inlined_call_operand.hbm [shape: f32[1,128], index: 1, kind: input, shape index: {}]   ;;  %s410_s2 = inlined_call_operand.vmem [shape: f32[1,128], index: 2, kind: input, shape index: {}]   ;;  %s411_s3 = inlined_call_operand.hbm [shape: f32[128,128], index: 3, kind: input, shape index: {}]   ;;  %s412_s4 = inlined_call_operand.vmem [shape: f32[1,128], index: 4, kind: input, shape index: {}]   ;;  %s413_s5 = inlined_call_operand.hbm [shape: f32[16,128], index: 5, kind: output, shape index: {}]  }
   0x1   :  { %11 = vsyncpa [#allocation7], 0  ;;  %s31_s20 = sshll.u32 %s409_s1, 4  ;;  %s32_s20 = int_to_ptr.hbm [resolvable:$true] %s31_s20 }
   0x2   :  { %12 = vsyncpa [#allocation5], 0  ;;  %s334_s21 = smov [#allocation6]   ;;  %s17_s25 = sshll.u32 %s408_s0, 4  ;;  %s18_s25 = int_to_ptr.hbm [resolvable:$true] %s17_s25 }
   0x3   :  { %s33_s22 = sshll.u32 %s334_s21, 4  ;;  %s335_s26 = smov [#allocation3]   ;;  %s34_s22 = int_to_ptr.vmem [resolvable:$true] %s33_s22 }
   0x4   :  { %36 = dma.hbm_to_vmem [thread:$0]  %s32_s20, 16, %s34_s22, [#allocation7]  }
   0x5   :  { %s19_s27 = sshll.u32 %s335_s26, 4  ;;  %s336_s28 = smov 128   ;;  %s20_s27 = int_to_ptr.vmem [resolvable:$true] %s19_s27 }
   0x6   :  { %s337_s29 = smov 8   ;;  %s43_s6 = sshll.u32 %s411_s3, 4  ;;  %s44_s6 = int_to_ptr.hbm [resolvable:$true] %s43_s6 }
   0x7   :  { %25 = dma.hbm_to_vmem [thread:$0]  %s18_s25, 256, %s20_s27, [#allocation4], %s336_s28, %s336_s28, %s337_s29  }
   0x8   :  { %s338_s7 = smov [#allocation8]  }
   0x9   :  { %s45_s8 = sshll.u32 %s338_s7, 4  ;;  %s46_s8 = int_to_ptr.vmem [resolvable:$true] %s45_s8 }
   0xa   :  { %51 = dma.hbm_to_vmem [thread:$0]  %s44_s6, 2048, %s46_s8, [#allocation7], %s336_s28, %s336_s28, %s337_s29  }
   0xb   :  { %328 = dma.done.wait [#allocation4], 256  }
   0xc   :  { %329 = vsyncadd [#allocation4], 4294967040 }
   0xd   :  { %330 = dma.done.wait [#allocation7], 2064  }
   0xe   :  { %331 = vsyncadd [#allocation7], 4294965232  ;;  %v70_v0 = vld [vmem:[#allocation3] sm:$0xff]  ;;  %v71_v1 = vld [vmem:[#allocation3 + $0x8] sm:$0xff]  ;;  %v339_v2 = vmov 128.0   ;;  %s186_s14 = sshll.u32 %s413_s5, 4  ;;  %s187_s14 = int_to_ptr.hbm [resolvable:$true] %s186_s14 }
   0xf   :  { %72 = vadd.xlane.f32.xlu0 %v70_v0  ;;  %226 = vrcp.f32 %v339_v2  ;;  %v150_v5 = vld [vmem:[#allocation8 + $0x78] sm:$0xff]  ;;  %v149_v6 = vld [vmem:[#allocation8 + $0x70] sm:$0xff]  ;;  %v148_v19 = vld [vmem:[#allocation8 + $0x68] sm:$0xff] }
  0x10   :  { %155 = vmatpush.msra.mxu0 %v150_v5  ;;  %200 = vmatpush.msra.mxu1 %v150_v5  ;;  %v147_v20 = vld [vmem:[#allocation8 + $0x60] sm:$0xff]  ;;  %v146_v21 = vld [vmem:[#allocation8 + $0x58] sm:$0xff]  ;;  %v145_v22 = vld [vmem:[#allocation8 + $0x50] sm:$0xff] }
  0x11   :  { %v144_v23 = vld [vmem:[#allocation8 + $0x48] sm:$0xff]  ;;  %v143_v24 = vld [vmem:[#allocation8 + $0x40] sm:$0xff]  ;;  %v142_v25 = vld [vmem:[#allocation8 + $0x38] sm:$0xff] }
  0x12   :  { %156 = vmatpush.msra.mxu0 %v149_v6  ;;  %201 = vmatpush.msra.mxu1 %v149_v6  ;;  %v141_v26 = vld [vmem:[#allocation8 + $0x30] sm:$0xff]  ;;  %v140_v27 = vld [vmem:[#allocation8 + $0x28] sm:$0xff]  ;;  %v139_v28 = vld [vmem:[#allocation8 + $0x20] sm:$0xff] }
  0x13   :  { %v138_v29 = vld [vmem:[#allocation8 + $0x18] sm:$0xff]  ;;  %v137_v30 = vld [vmem:[#allocation8 + $0x10] sm:$0xff]  ;;  %v136_v31 = vld [vmem:[#allocation8 + $0x8] sm:$0xff] }
  0x14   :  { %157 = vmatpush.msra.mxu0 %v148_v19  ;;  %202 = vmatpush.msra.mxu1 %v148_v19  ;;  %v135_v32 = vld [vmem:[#allocation8] sm:$0xff]  ;;  %v223_v47 = vld [vmem:[#allocation6] ss:$0 sm:$0xff]  ;;  %v224_v51 = vld [vmem:[%s410_s2] ss:$0 sm:$0xff]  ;;  %s340_s2 = smov [#allocation9]  }
  0x15   :  { %v227_v3 = vpop.eup %226  ;;  %v225_v61 = vld [vmem:[%s412_s4] ss:$0 sm:$0xff]  ;;  %s184_s11 = sshll.u32 %s340_s2, 4  ;;  %s185_s11 = int_to_ptr.vmem [resolvable:$true] %s184_s11 }
  0x16   :  { %v77_v4 = vmul.f32 128.0, %v227_v3  ;;  %vm81_vm0 = vweird.f32 %v227_v3  ;;  %158 = vmatpush.msra.mxu0 %v147_v20  ;;  %203 = vmatpush.msra.mxu1 %v147_v20 }
  0x17   :  { %74 = vadd.xlane.f32.xlu0 %v71_v1 }
  0x18   :  { %v78_v7 = vsub.f32 1.0, %v77_v4  ;;  %159 = vmatpush.msra.mxu0 %v146_v21  ;;  %204 = vmatpush.msra.mxu1 %v146_v21 }
  0x1a   :  { %v79_v8 = vmul.f32 %v227_v3, %v78_v7  ;;  %160 = vmatpush.msra.mxu0 %v145_v22  ;;  %205 = vmatpush.msra.mxu1 %v145_v22 }
  0x1c   :  { %v80_v9 = vadd.f32 %v227_v3, %v79_v8  ;;  %161 = vmatpush.msra.mxu0 %v144_v23  ;;  %206 = vmatpush.msra.mxu1 %v144_v23 }
  0x1e   :  { %v82_v10 = vsel %vm81_vm0, %v227_v3, %v80_v9  ;;  %162 = vmatpush.msra.mxu0 %v143_v24  ;;  %207 = vmatpush.msra.mxu1 %v143_v24 }
  0x20   :  { %163 = vmatpush.msra.mxu0 %v142_v25  ;;  %208 = vmatpush.msra.mxu1 %v142_v25 }
  0x22   :  { %164 = vmatpush.msra.mxu0 %v141_v26  ;;  %209 = vmatpush.msra.mxu1 %v141_v26 }
  0x24   :  { %165 = vmatpush.msra.mxu0 %v140_v27  ;;  %210 = vmatpush.msra.mxu1 %v140_v27 }
  0x26   :  { %166 = vmatpush.msra.mxu0 %v139_v28  ;;  %211 = vmatpush.msra.mxu1 %v139_v28 }
  0x28   :  { %167 = vmatpush.msra.mxu0 %v138_v29  ;;  %212 = vmatpush.msra.mxu1 %v138_v29 }
  0x2a   :  { %168 = vmatpush.msra.mxu0 %v137_v30  ;;  %213 = vmatpush.msra.mxu1 %v137_v30 }
  0x2c   :  { %169 = vmatpush.msra.mxu0 %v136_v31  ;;  %214 = vmatpush.msra.mxu1 %v136_v31 }
  0x2e   :  { %170 = vmatpush.msra.mxu0 %v135_v32  ;;  %215 = vmatpush.msra.mxu1 %v135_v32 }
  0x82   :  { %v73_v11 = vpop.xlane.xlu0 %72 }
  0x83   :  { %v83_v12 = vmul.f32 %v82_v10, %v73_v11 }
  0x85   :  { %v386_v13 = vsub.f32 %v70_v0, %v83_v12 }
  0x87   :  { %v87_v14 = vmul.f32 %v386_v13, %v386_v13 }
  0x89   :  { %89 = vadd.xlane.f32.xlu1 %v87_v14 }
  0x8a   :  { %v75_v15 = vpop.xlane.xlu0 %74 }
  0x8b   :  { %v84_v16 = vmul.f32 %v82_v10, %v75_v15 }
  0x8d   :  { %v390_v17 = vsub.f32 %v71_v1, %v84_v16 }
  0x8f   :  { %v88_v18 = vmul.f32 %v390_v17, %v390_v17 }
  0x91   :  { %91 = vadd.xlane.f32.xlu1 %v88_v18 }
  0xfc   :  { %v90_v33 = vpop.xlane.xlu1 %89 }
  0xfd   :  { %v93_v34 = vmul.f32 %v90_v33, %v82_v10 }
  0xff   :  { %v95_v35 = vadd.f32 1e-05, %v93_v34 }
 0x101   :  { %228 = vrsqrt.f32 %v95_v35  ;;  %vm103_vm2 = vweird.f32 %v95_v35 }
 0x104   :  { %v92_v36 = vpop.xlane.xlu1 %91 }
 0x105   :  { %v94_v37 = vmul.f32 %v92_v36, %v82_v10 }
 0x107   :  { %v229_v38 = vpop.eup %228  ;;  %v96_v39 = vadd.f32 1e-05, %v94_v37 }
 0x108   :  { %v98_v40 = vmul.f32 %v229_v38, %v95_v35  ;;  %vm104_vm1 = vweird.f32 %v229_v38 }
 0x109   :  { %230 = vrsqrt.f32 %v96_v39  ;;  %vm105_vm3 = vmor %vm103_vm2, %vm104_vm1  ;;  %vm113_vm5 = vweird.f32 %v96_v39 }
 0x10a   :  { %v99_v41 = vmul.f32 %v229_v38, %v98_v40 }
 0x10c   :  { %v100_v42 = vmul.f32 0.5, %v99_v41 }
 0x10e   :  { %v101_v43 = vsub.f32 1.5, %v100_v42 }
 0x10f   :  { %v231_v44 = vpop.eup %230 }
 0x110   :  { %v102_v45 = vmul.f32 %v229_v38, %v101_v43  ;;  %v108_v46 = vmul.f32 %v231_v44, %v96_v39  ;;  %vm114_vm4 = vweird.f32 %v231_v44 }
 0x111   :  { %vm115_vm6 = vmor %vm113_vm5, %vm114_vm4 }
 0x112   :  { %v109_v48 = vmul.f32 %v231_v44, %v108_v46  ;;  %v106_v49 = vsel %vm105_vm3, %v229_v38, %v102_v45 }
 0x113   :  { %v119_v50 = vmul.f32 %v106_v49, %v386_v13 }
 0x114   :  { %v110_v52 = vmul.f32 0.5, %v109_v48 }
 0x115   :  { %v124_v53 = vmul.f32 %v223_v47, %v119_v50 }
 0x116   :  { %v111_v54 = vsub.f32 1.5, %v110_v52 }
 0x117   :  { %v129_v55 = vadd.f32 %v224_v51, %v124_v53 }
 0x118   :  { %v112_v56 = vmul.f32 %v231_v44, %v111_v54 }
 0x119   :  { %171 = vmatmul.f32.vlgmr.msra.gmra.mxu0 %v129_v55 }
 0x11a   :  { %v116_v57 = vsel %vm115_vm6, %v231_v44, %v112_v56 }
 0x11b   :  { %v120_v58 = vmul.f32 %v116_v57, %v390_v17 }
 0x11d   :  { %v125_v59 = vmul.f32 %v223_v47, %v120_v58 }
 0x11f   :  { %v130_v60 = vadd.f32 %v224_v51, %v125_v59 }
 0x121   :  { %174 = vmatmul.f32.vlgmr.msra.gmra.mxu1 %v130_v60 }
 0x196   :  { %v172_v62 = vpop.f32.mrf.mxu0 }
 0x197   :  { %v173_v63 = vadd.f32 %v225_v61, %v172_v62 }
 0x199   :  { %178 = vst [vmem:[#allocation9] sm:$0xff] %v173_v63 }
 0x19e   :  { %v175_v0 = vpop.f32.mrf.mxu1 }
 0x19f   :  { %v176_v1 = vadd.f32 %v225_v61, %v175_v0 }
 0x1a1   :  { %179 = vst [vmem:[#allocation9 + $0x8] sm:$0xff] %v176_v1 }
 0x1a2   :  { %192 = dma.vmem_to_hbm [thread:$0]  %s185_s11, 256, %s187_s14, [#allocation5], %s336_s28, %s336_s28, %s337_s29  }
 0x1a3   :  { %332 = dma.done.wait [#allocation5], 256  }
 0x1a4   :  { %333 = vsyncadd [#allocation5], 4294967040 }
 0x1a5   :  { %197 = vsyncpa [#allocation4], 1 }
 0x1a6   :  { %198 = vsyncpa [#allocation7], 1 }
 0x1a7   :  { %199 = vsyncpa [#allocation5], 1 }

</bundles_post_ra>
